<compile_context>
chip_gen: v7x
topology: tpu7x:2x2x1
jax: 0.10.0
libtpu: 0.0.40
codegen_flags: <defaults>
</compile_context>

<pallas_src>
import jax
import jax.numpy as jnp
from jax.experimental import pallas as pl
from jax.experimental.pallas import tpu as pltpu

_LANES = 512            # lane-dense slab width (multiple of 128)
_MAX_BLOCK_ROWS = 1024  # 1024 x 512 f32 = 2 MiB/block; in+out double-buffered = 8 MiB VMEM


def _clone_kernel(x_ref, rec_ref):
    # Single load, single store: the recorded clone. No passthrough store.
    rec_ref[...] = x_ref[...]


def _pallas_clone_2d(x2d):
    rows, cols = x2d.shape
    # Block rows: either the whole row extent (always legal) or a
    # (8,128)-aligned tile that keeps VMEM usage bounded and pipelined.
    block_rows = rows if rows <= _MAX_BLOCK_ROWS else _MAX_BLOCK_ROWS
    grid = (pl.cdiv(rows, block_rows),)
    nbytes = x2d.size * x2d.dtype.itemsize
    return pl.pallas_call(
        _clone_kernel,
        out_shape=jax.ShapeDtypeStruct((rows, cols), x2d.dtype),
        grid_spec=pltpu.PrefetchScalarGridSpec(
            num_scalar_prefetch=0,
            grid=grid,
            in_specs=[pl.BlockSpec((block_rows, cols), lambda i: (i, 0))],
            out_specs=pl.BlockSpec((block_rows, cols), lambda i: (i, 0)),
        ),
        compiler_params=pltpu.CompilerParams(
            dimension_semantics=("parallel",),
        ),
        cost_estimate=pl.CostEstimate(
            flops=0, transcendentals=0, bytes_accessed=2 * nbytes),
    )(x2d)


class RecordingObserver:
    """JAX/Pallas port of torch.quantization.observer.RecordingObserver.

    Records (clones of) every tensor seen in forward and returns the input
    unchanged. dtype / qscheme / reduce_range are kept for API parity only.
    """

    def __init__(self, dtype="quint8", qscheme="per_tensor_affine",
                 reduce_range=False):
        assert dtype in ("qint8", "quint8")
        assert qscheme in ("per_tensor_affine", "per_tensor_symmetric",
                           "per_channel_affine", "per_channel_symmetric")
        self.dtype = dtype
        self.qscheme = qscheme
        self.reduce_range = reduce_range
        self.eps = float(jnp.finfo(jnp.float32).eps)
        self.tensor_val = []

    def __call__(self, x):
        return self.forward(x)

    def forward(self, x):
        x = jnp.asarray(x)
        if x.size == 0:
            # Nothing to copy; immutable array doubles as its own "clone".
            self.tensor_val.append(x)
            return x

        orig_shape = x.shape
        flat = x.reshape(-1)                      # free view for contiguous layout
        n = flat.shape[0]
        n_pad = ((n + _LANES - 1) // _LANES) * _LANES
        if n_pad != n:
            flat = jnp.pad(flat, (0, n_pad - n))  # align to a full lane row
        x2d = flat.reshape(n_pad // _LANES, _LANES)

        rec2d = _pallas_clone_2d(x2d)

        if n_pad == n:
            rec = rec2d.reshape(orig_shape)
        else:
            rec = rec2d.reshape(-1)[:n].reshape(orig_shape)

        self.tensor_val.append(rec)  # the recorded clone
        return x                     # identity passthrough: no kernel write needed

    def calculate_qparams(self):
        raise Exception(
            "calculate_qparams should not be called for RecordingObserver")

    def get_qparams(self):
        return self.calculate_qparams()

    def get_tensor_value(self):
        return self.tensor_val


if __name__ == "__main__":
    key = jax.random.PRNGKey(0)
    # Small NCHW conv-style input: batch=2, channels=4, spatial=16x16.
    x = jax.random.normal(key, (2, 4, 16, 16), dtype=jnp.float32)

    obs = RecordingObserver(dtype="quint8", qscheme="per_tensor_affine",
                            reduce_range=False)
    y = obs(x)
    y = jax.block_until_ready(y)
    rec = jax.block_until_ready(obs.get_tensor_value()[0])

    assert y.shape == x.shape and y.dtype == x.dtype
    assert rec.shape == x.shape and rec.dtype == x.dtype
    assert bool(jnp.array_equal(y, x))
    assert bool(jnp.array_equal(rec, x))
    assert len(obs.get_tensor_value()) == 1

    # Exercise a second, padded-size call (n not a multiple of 512).
    x2 = jax.random.normal(jax.random.PRNGKey(1), (3, 5, 7), dtype=jnp.float32)
    y2 = jax.block_until_ready(obs(x2))
    rec2 = jax.block_until_ready(obs.get_tensor_value()[1])
    assert bool(jnp.array_equal(y2, x2))
    assert bool(jnp.array_equal(rec2, x2))
    assert len(obs.get_tensor_value()) == 2

    print("KERNEL_OK")
</pallas_src>

<mosaic_0001>
module attributes {stable_mosaic.version = 11 : i64} {
  func.func @_clone_kernel(%arg0: i32, %arg1: memref<4x512xf32, #tpu.memory_space<vmem>>, %arg2: memref<4x512xf32, #tpu.memory_space<vmem>>) attributes {dimension_semantics = [#tpu.dimension_semantics<parallel>], iteration_bounds = array<i64: 1>, scalar_prefetch = 0 : i64, scratch_operands = 0 : i64, tpu.core_type = #tpu.core_type<tc>, window_params = [{transform_indices = @transform_0, window_bounds = array<i64: 4, 512>}, {transform_indices = @transform_1, window_bounds = array<i64: 4, 512>}]} {
    %c0 = arith.constant 0 : index
    %c0_0 = arith.constant 0 : index
    %0 = vector.load %arg1[%c0, %c0_0] : memref<4x512xf32, #tpu.memory_space<vmem>>, vector<4x512xf32>
    %c0_1 = arith.constant 0 : index
    %c0_2 = arith.constant 0 : index
    %1 = vector.load %arg2[%c0_1, %c0_2] : memref<4x512xf32, #tpu.memory_space<vmem>>, vector<4x512xf32>
    tpu.vector_store %arg2[%c0_1, %c0_2], %0 {strides = array<i32>} : memref<4x512xf32, #tpu.memory_space<vmem>>, vector<4x512xf32>,
    return
  }
  func.func @transform_0(%arg0: i32) -> (i32, i32) {
    %c0_i32 = arith.constant 0 : i32
    %c0_i32_0 = arith.constant 0 : i32
    return %arg0, %c0_i32 : i32, i32
  }
  func.func @transform_1(%arg0: i32) -> (i32, i32) {
    %c0_i32 = arith.constant 0 : i32
    %c0_i32_0 = arith.constant 0 : i32
    return %arg0, %c0_i32 : i32, i32
  }
}

</mosaic_0001>

<bundles_post_ra>
// kernel: tpu_custom_call.1
= control target key start
LH: loop header
LB: loop body
LE: loop exit
PB: predicated region body
PF: predicated region fallthrough
CT: control target
= control target key end

     0   :  { %6 = vsyncpa [#allocation3], 0  ;;  %s126_s0 = inlined_call_operand.hbm [shape: f32[4,512], index: 0, kind: input, shape index: {}]   ;;  %s127_s1 = inlined_call_operand.hbm [shape: f32[4,512], index: 1, kind: output, shape index: {}]  }
   0x1   :  { %7 = vsyncpa [#allocation4], 0  ;;  %s90_s6 = smov [#allocation2]   ;;  %s42_s10 = scalar_lea.hbm %s126_s0, 256 }
   0x2   :  { %s14_s7 = sshll.u32 %s90_s6, 4  ;;  %p43_p0 = scmp.ne.s32.totalorder %s126_s0, %s42_s10  ;;  %s15_s7 = int_to_ptr.vmem [resolvable:$true] %s14_s7 }
   0x3   :  { %p46_p1 = scmp.lt.u32.totalorder %s42_s10, %s126_s0 }
   0x5   :  { %p48_p2 = pnand %p46_p1, %p43_p0 }
   0x7   :  { %51 = shalt.err (!%p48_p2)
}
   0x8   :  { %s52_s15 = scalar_lea.vmem %s15_s7, 256  ;;  %p57_p4 = scmp.lt.s32.totalorder %s15_s7, %s15_s7 }
   0x9   :  { %p53_p3 = scmp.ne.s32.totalorder %s15_s7, %s52_s15  ;;  %p58_p5 = scmp.lt.s32.totalorder %s52_s15, %s52_s15 }
   0xb   :  { %p59_p6 = por %p58_p5, %p57_p4 }
   0xd   :  { %p60_p7 = pnand %p59_p6, %p53_p3 }
   0xf   :  { %63 = shalt.err (!%p60_p7)
}
  0x10   :  { %17 = dma.hbm_to_vmem [thread:$0]  %s126_s0, 256, %s15_s7, [#allocation3]  }
  0x11   :  { %86 = dma.done.wait [#allocation3], 256  }
  0x12   :  { %87 = vsyncadd [#allocation3], 4294967040  ;;  %s91_s18 = smov [#allocation5]   ;;  %v21_v0 = vld [vmem:[#allocation2] sm:$0xff]  ;;  %v22_v1 = vld [vmem:[#allocation2 + $0x8] sm:$0xff] }
  0x13   :  { %s31_s19 = sshll.u32 %s91_s18, 4  ;;  %23 = vst [vmem:[#allocation5] sm:$0xff] %v21_v0  ;;  %24 = vst [vmem:[#allocation5 + $0x8] sm:$0xff] %v22_v1  ;;  %s32_s19 = int_to_ptr.vmem [resolvable:$true] %s31_s19 }
  0x14   :  { %s64_s20 = scalar_lea.vmem %s32_s19, 256  ;;  %p69_p9 = scmp.lt.s32.totalorder %s32_s19, %s32_s19 }
  0x15   :  { %p65_p8 = scmp.ne.s32.totalorder %s32_s19, %s64_s20  ;;  %p70_p10 = scmp.lt.s32.totalorder %s64_s20, %s64_s20 }
  0x17   :  { %p71_p11 = por %p70_p10, %p69_p9 }
  0x19   :  { %p72_p12 = pnand %p71_p11, %p65_p8 }
  0x1b   :  { %75 = shalt.err (!%p72_p12)
}
  0x1c   :  { %s76_s0 = scalar_lea.hbm %s127_s1, 256 }
  0x1d   :  { %p77_p13 = scmp.ne.s32.totalorder %s127_s1, %s76_s0  ;;  %p80_p0 = scmp.lt.u32.totalorder %s76_s0, %s127_s1 }
  0x1f   :  { %p82_p1 = pnand %p80_p0, %p77_p13 }
  0x21   :  { %85 = shalt.err (!%p82_p1)
}
  0x22   :  { %34 = dma.vmem_to_hbm [thread:$0]  %s32_s19, 256, %s127_s1, [#allocation4]  }
  0x23   :  { %88 = dma.done.wait [#allocation4], 256  }
  0x24   :  { %89 = vsyncadd [#allocation4], 4294967040 }
  0x25   :  { %38 = vsyncpa [#allocation3], 1 }
  0x26   :  { %39 = vsyncpa [#allocation4], 1 }

</bundles_post_ra>
